<compile_context>
chip_gen: v7x
topology: tpu7x:2x2x1
jax: 0.10.0
libtpu: 0.0.40
codegen_flags: <defaults>
</compile_context>

<pallas_src>
import functools
import math

import jax
import jax.numpy as jnp
from jax.experimental import pallas as pl
from jax.experimental.pallas import tpu as pltpu


def make_inv_freq(d_model):
    """(1, d_model) f32 vector with inv_freq[j] = 10000**(-(j mod d)/(d-1)).

    pe[p, j] = p * inv_freq[j] reproduces the PyTorch module's buffer for even
    d_model (the reference construction only yields d_model columns then).
    Note d_model == 2 would divide by zero in the reference formula too.
    """
    assert d_model % 2 == 0 and d_model >= 4, "reference formula needs even d_model >= 4"
    d = d_model // 2.0
    j = jnp.arange(d_model, dtype=jnp.float32)
    jm = jnp.where(j < d, j, j - d)
    return (10000.0 ** (-(jm / (d - 1.0)))).reshape(1, d_model)


def make_pe(d_model, max_seq_len, dtype=jnp.float32):
    """Full (max_seq_len, d_model) table -- used only by the pure-JAX reference."""
    pos = jnp.arange(0.0, max_seq_len, dtype=jnp.float32)[:, None]
    return (pos * make_inv_freq(d_model)).astype(dtype)


def pe_kernel(inv_freq_ref, x_ref, o_ref, *, scale, ts):
    # inv_freq_ref: (1, d_model) f32;  x_ref / o_ref: (bt, ts, d_model)
    d_model = x_ref.shape[-1]
    s = pl.program_id(1)
    # Synthesize this tile of the pe table on the VPU: pos[p, j] = s*ts + p.
    row = jax.lax.broadcasted_iota(jnp.int32, (ts, d_model), 0)
    pos = (row + s * ts).astype(jnp.float32)                      # (ts, d_model)
    pe_tile = pos * inv_freq_ref[...]                             # free VPU filler
    x = x_ref[...].astype(jnp.float32)
    o_ref[...] = (x * scale + pe_tile[None, :, :]).astype(o_ref.dtype)
    # dropout == identity (inference).  # TODO(synk): training dropout w/ pltpu PRNG.


def _sublane_multiple(dtype):
    # Packed dtypes need more rows per vreg tile: f32 -> 8, bf16 -> 16, int8/fp8 -> 32.
    return {4: 8, 2: 16, 1: 32}.get(jnp.dtype(dtype).itemsize, 8)


def _pick_tiles(batch, seq, d_model, dtype, target_bytes=2 * 1024 * 1024):
    """Pick (batch_tile, seq_tile) giving large per-step payload within VMEM budget."""
    itemsize = jnp.dtype(dtype).itemsize
    sub = _sublane_multiple(dtype)
    row_bytes = d_model * itemsize

    if seq * row_bytes <= target_bytes:
        ts = seq                                     # whole sequence in one block
    else:
        ts = seq                                     # full-extent fallback (always legal)
        # TODO(synk): masked partial last tile (pl.cdiv grid) for seq lengths
        # with no sublane-aligned divisor, to avoid a whole-seq block on v7x.
        max_rows = max(sub, target_bytes // row_bytes)
        for cand in range(min(seq, max_rows), sub - 1, -1):
            if seq % cand == 0 and cand % sub == 0:
                ts = cand
                break

    bt = 1
    if ts == seq:
        # Fold batch into the block for payload, but keep >= 2 grid steps when
        # batch >= 2 so the parallel grid shards across both v7x TensorCores.
        max_bt = batch if batch < 2 else max(1, batch // 2)
        max_bt = min(max_bt, max(1, target_bytes // (ts * row_bytes)))
        for cand in range(max_bt, 0, -1):
            if batch % cand == 0:
                bt = cand
                break
    return bt, ts


def positional_encoder(x, *, tiles=None):
    """x: (batch, seq, d_model) -> x * sqrt(d_model) + pe[:seq] (dropout=identity)."""
    batch, seq, d_model = x.shape
    bt, ts = tiles if tiles is not None else _pick_tiles(batch, seq, d_model, x.dtype)
    assert batch % bt == 0 and seq % ts == 0

    scale = math.sqrt(d_model)
    inv_freq = make_inv_freq(d_model)                # tiny (1, d_model) f32, built once

    itemsize = jnp.dtype(x.dtype).itemsize
    cost = pl.CostEstimate(
        flops=3 * batch * seq * d_model,             # scale mul + pe mul + add
        transcendentals=0,
        bytes_accessed=2 * x.size * itemsize + int(inv_freq.size) * 4,
    )

    return pl.pallas_call(
        functools.partial(pe_kernel, scale=scale, ts=ts),
        out_shape=jax.ShapeDtypeStruct((batch, seq, d_model), x.dtype),
        grid_spec=pltpu.PrefetchScalarGridSpec(
            num_scalar_prefetch=0,
            grid=(batch // bt, seq // ts),
            in_specs=[
                pl.BlockSpec((1, d_model), lambda b, s: (0, 0)),           # inv_freq
                pl.BlockSpec((bt, ts, d_model), lambda b, s: (b, s, 0)),   # x tile
            ],
            out_specs=pl.BlockSpec((bt, ts, d_model), lambda b, s: (b, s, 0)),
        ),
        compiler_params=pltpu.CompilerParams(
            dimension_semantics=("parallel", "parallel")),
        cost_estimate=cost,
    )(inv_freq, x)


if __name__ == "__main__":
    # Small deterministic problem; d_model=128 keeps the output last dim
    # lane-dense (multiple of 128).
    batch, seq, d_model, max_seq_len = 2, 8, 128, 200

    key = jax.random.PRNGKey(0)
    x = jax.random.normal(key, (batch, seq, d_model), dtype=jnp.float32)

    out = jax.block_until_ready(positional_encoder(x))

    # Pure-JAX reference: x * sqrt(d_model) + pe[:seq]  (dropout = identity).
    pe = make_pe(d_model, max_seq_len)
    ref = x * math.sqrt(d_model) + pe[:seq][None, :, :]
    assert out.shape == (batch, seq, d_model)
    assert jnp.allclose(out, ref, atol=1e-5, rtol=1e-5), "mismatch vs reference"

    print("KERNEL_OK")
</pallas_src>

<mosaic_0001>
module attributes {stable_mosaic.version = 11 : i64} {
  func.func @pe_kernel(%arg0: i32, %arg1: i32, %arg2: memref<1x128xf32, #tpu.memory_space<vmem>>, %arg3: memref<1x8x128xf32, #tpu.memory_space<vmem>>, %arg4: memref<1x8x128xf32, #tpu.memory_space<vmem>>) attributes {dimension_semantics = [#tpu.dimension_semantics<parallel>, #tpu.dimension_semantics<parallel>], iteration_bounds = array<i64: 2, 1>, scalar_prefetch = 0 : i64, scratch_operands = 0 : i64, tpu.core_type = #tpu.core_type<tc>, window_params = [{pipeline_mode = #tpu.pipeline_mode<synchronous>, transform_indices = @transform_0, window_bounds = array<i64: 1, 128>}, {transform_indices = @transform_1, window_bounds = array<i64: 1, 8, 128>}, {transform_indices = @transform_2, window_bounds = array<i64: 1, 8, 128>}]} {
    %0 = tpu.iota {dimensions = array<i32: 0>} : vector<8x128xi32>
    %c8_i32 = arith.constant 8 : i32
    %1 = arith.muli %arg1, %c8_i32 : i32
    %2 = vector.broadcast %1 : i32 to vector<8x128xi32>
    %3 = arith.addi %0, %2 : vector<8x128xi32>
    %4 = arith.sitofp %3 : vector<8x128xi32> to vector<8x128xf32>
    %c0 = arith.constant 0 : index
    %c0_0 = arith.constant 0 : index
    %5 = vector.load %arg2[%c0, %c0_0] : memref<1x128xf32, #tpu.memory_space<vmem>>, vector<1x128xf32>
    %6 = vector.broadcast %5 : vector<1x128xf32> to vector<8x128xf32>
    %7 = arith.mulf %4, %6 : vector<8x128xf32>
    %c0_1 = arith.constant 0 : index
    %c0_2 = arith.constant 0 : index
    %c0_3 = arith.constant 0 : index
    %8 = vector.load %arg3[%c0_1, %c0_2, %c0_3] : memref<1x8x128xf32, #tpu.memory_space<vmem>>, vector<1x8x128xf32>
    %cst = arith.constant 11.3137083 : f32
    %9 = vector.broadcast %cst : f32 to vector<1x8x128xf32>
    %10 = arith.mulf %8, %9 : vector<1x8x128xf32>
    %11 = vector.shape_cast %7 : vector<8x128xf32> to vector<1x8x128xf32>
    %12 = arith.addf %10, %11 : vector<1x8x128xf32>
    %c0_4 = arith.constant 0 : index
    %c0_5 = arith.constant 0 : index
    %c0_6 = arith.constant 0 : index
    %13 = vector.load %arg4[%c0_4, %c0_5, %c0_6] : memref<1x8x128xf32, #tpu.memory_space<vmem>>, vector<1x8x128xf32>
    tpu.vector_store %arg4[%c0_4, %c0_5, %c0_6], %12 {strides = array<i32>} : memref<1x8x128xf32, #tpu.memory_space<vmem>>, vector<1x8x128xf32>,
    return
  }
  func.func @transform_0(%arg0: i32, %arg1: i32) -> (i32, i32) {
    %c0_i32 = arith.constant 0 : i32
    %c0_i32_0 = arith.constant 0 : i32
    %c0_i32_1 = arith.constant 0 : i32
    return %c0_i32, %c0_i32_0 : i32, i32
  }
  func.func @transform_1(%arg0: i32, %arg1: i32) -> (i32, i32, i32) {
    %c0_i32 = arith.constant 0 : i32
    %c0_i32_0 = arith.constant 0 : i32
    return %arg0, %arg1, %c0_i32 : i32, i32, i32
  }
  func.func @transform_2(%arg0: i32, %arg1: i32) -> (i32, i32, i32) {
    %c0_i32 = arith.constant 0 : i32
    %c0_i32_0 = arith.constant 0 : i32
    return %arg0, %arg1, %c0_i32 : i32, i32, i32
  }
}

</mosaic_0001>

<bundles_post_ra>
// kernel: tpu_custom_call.1
= control target key start
LH: loop header
LB: loop body
LE: loop exit
PB: predicated region body
PF: predicated region fallthrough
CT: control target
= control target key end

     0   :  { %7 = vsyncpa [#allocation3], 0  ;;  %s783_s0 = inlined_call_operand.hbm [shape: f32[1,128], index: 0, kind: input, shape index: {}]   ;;  %s784_s1 = inlined_call_operand.hbm [shape: f32[2,8,128], index: 1, kind: input, shape index: {}]   ;;  %s785_s2 = inlined_call_operand.hbm [shape: f32[2,8,128], index: 2, kind: output, shape index: {}]  }
   0x1   :  { %8 = vsyncpa [#allocation6], 0 }
   0x2   :  { %10 = vsyncpa [#allocation6 + $0x1], 0 }
   0x3   :  { %11 = vsyncpa [#allocation4], 0 }
   0x4   :  { %13 = vsyncpa [#allocation4 + $0x1], 0  ;;  %s567_s9 = smov 0   ;;  %s569_s10 = smov 0  }
   0x5   :  { %s571_s11 = smov 0   ;;  %s573_s12 = smov 0  }
   0x6   :  { %s575_s13 = smov 0   ;;  %s577_s14 = smov 0  }
   0x7 LB: > { %s314_s15 = sadd.s32 4294967295, %s547_s14   ;;  %s315_s16 = sadd.s32 4294967294, %s547_s14   ;;  %s547_s14 = sphi %s577_s14, %s19_s14   ;;  %s543_s13 = sphi %s575_s13, %s810_s13   ;;  %s539_s12 = sphi %s573_s12, %s809_s12   ;;  %s535_s11 = sphi %s571_s11, %s808_s11   ;;  %s531_s10 = sphi %s569_s10, %s807_s10   ;;  %s527_s9 = sphi %s567_s9, %s806_s9  }
   0x8   : > { %p74_p0 = scmp.ne.s32.totalorder %s531_s10, %s527_s9  ;;  %p601_p1 = scmp.eq.s32.totalorder %s314_s15, 0 }
   0x9   : > { %p605_p2 = scmp.eq.s32.totalorder %s314_s15, 1  ;;  %p106_p3 = scmp.eq.s32.totalorder %s315_s16, 1 }
   0xa   : > { %s790_s17 = scalar_select %p601_p1, 1, 0 }
   0xb   : > { %s791_s18 = scalar_select %p605_p2, 1, 0 }
   0xc   : > { %p611_p4 = por %p601_p1, %p74_p0  ;;  %p316_p5 = scmp.ge.s32.totalorder %s547_s14, 1 }
   0xd   : > { %p616_p6 = por %p106_p3, %p74_p0  ;;  %p113_p7 = scmp.lt.s32.totalorder %s547_s14, 3 }
   0xe   : > { %s792_s19 = scalar_select %p611_p4, 1, 0 }
   0xf   : > { %s793_s20 = scalar_select %p616_p6, 1, 0 }
  0x10   : > { %p621_p8 = pnand %p316_p5, %p113_p7  ;;  %s549_s22 = smov [#allocation2]  }
  0x11   : > { %s126_s23 = sshll.u32 %s549_s22, 4  ;;  %s31_s25 = sadd.s32 1, %s543_s13  ;;  %s127_s23 = int_to_ptr.vmem [resolvable:$true] %s126_s23 }
  0x12   : > { %s794_s21 = scalar_select %p621_p8, 1, 0 }
  0x13   : > { %p338_p10 = pneg %p621_p8  ;;  %s61_s26 = sadd.s32 1, %s535_s11 }
  0x14   : > { %p636_p12 = scmp.ge.s32.totalorder %s31_s25, 2  ;;  %s403_s30 = scalar_lea.hbm %s783_s0, 16 }
  0x15   : > { %p630_p11 = pnand %p338_p10, %p601_p1  ;;  %p404_p13 = scmp.ne.s32.totalorder %s783_s0, %s403_s30 }
  0x16   : > { %s796_s27 = scalar_select %p636_p12, 1, 0 }
  0x17   : > { %p405_p0 = pneg %p630_p11  ;;  %p410_p7 = scmp.lt.u32.totalorder %s403_s30, %s783_s0 }
  0x19   : > { %p406_p3 = pnand %p405_p0, %p404_p13 }
  0x1b   : > { %p407_p5 = pneg %p406_p3 }
  0x1d   : > { %p412_p10 = pnand %p410_p7, %p407_p5 }
  0x1f   : > { %415 = shalt.err (!%p412_p10)
}
  0x20   : > { %s416_s7 = scalar_lea.vmem %s127_s23, 16  ;;  %s423_s8 = scalar_lea.vmem %s127_s23, 32 }
  0x21   : > { %p417_p9 = scmp.ne.s32.totalorder %s127_s23, %s416_s7  ;;  %p424_p1 = scmp.lt.s32.totalorder %s127_s23, %s127_s23 }
  0x22   : > { %p425_p8 = scmp.lt.s32.totalorder %s423_s8, %s416_s7 }
  0x23   : > { %p419_p6 = pnand %p417_p9, %p405_p0 }
  0x24   : > { %p426_p2 = por %p425_p8, %p424_p1 }
  0x25   : > { %p420_p4 = pneg %p419_p6 }
  0x27   : > { %p427_p12 = pnand %p426_p2, %p420_p4 }
  0x29   : > { %430 = shalt.err (!%p427_p12)
}
  0x2a   : > { %341 = dma.hbm_to_vmem [thread:$0]  (!%p630_p11), %s783_s0, 16, %s127_s23, [#allocation3]  }
  0x2b   : > { %p797_p1 = scmp.ne.s32.totalorder %s796_s27, 0  ;;  %p68_p2 = scmp.ne.s32.totalorder %s535_s11, %s531_s10 }
  0x2c   : > { %p69_p4 = scmp.eq.s32.totalorder %s547_s14, 0  ;;  %p351_p6 = scmp.lt.s32.totalorder %s547_s14, 2 }
  0x2d   : > { %s812_s25 = smov (%p797_p1, %s31_s25), 0  ;;  %p798_p12 = scmp.ne.s32.totalorder %s791_s18, 0 }
  0x2e   : > { %s56_s22 = ssub.s32 %s543_s13, %s812_s25  ;;  %p70_p9 = por %p69_p4, %p68_p2 }
  0x2f   : > { %p59_p8 = scmp.eq.s32.totalorder %s56_s22, 0  ;;  %p668_p13 = por %p798_p12, %p68_p2 }
  0x30   : > { %s137_s28 = sand.u32 1, %s535_s11   ;;  %s320_s27 = sshll.u32 %s543_s13, 7 }
  0x31   : > { %s676_s29 = scalar_select %p59_p8, %s535_s11, %s61_s26  }
  0x32   : > { %s319_s23 = sshll.u32 %s137_s28, 3  ;;  %s682_s4 = scalar_lea.hbm %s784_s1, %s320_s27 }
  0x33   : > { %s141_s18 = scalar_lea.vmem [#allocation5], %s319_s23  ;;  %p686_p11 = pnand %p351_p6, %p70_p9 }
  0x34   : > { %s149_s5 = sshll.u32 %s141_s18, 4  ;;  %s138_s26 = scalar_lea.sflag [#allocation6], %s137_s28  ;;  %s684_s5 = int_to_ptr.vmem [resolvable:$true] %s149_s5 }
  0x35   : > { %s431_s7 = scalar_lea.hbm %s682_s4, 128  ;;  %p433_p3 = pneg %p686_p11 }
  0x36   : > { %p432_p0 = scmp.ne.s32.totalorder %s682_s4, %s431_s7  ;;  %s436_s16 = scalar_lea.hbm %s784_s1, 256 }
  0x37   : > { %p437_p10 = scmp.lt.u32.totalorder %s682_s4, %s784_s1  ;;  %p438_p1 = scmp.lt.u32.totalorder %s436_s16, %s431_s7 }
  0x38   : > { %p434_p5 = pnand %p433_p3, %p432_p0  ;;  %p440_p4 = scmp.lt.u32.totalorder %s431_s7, %s682_s4 }
  0x39   : > { %p439_p2 = por %p438_p1, %p437_p10 }
  0x3a   : > { %p435_p7 = pneg %p434_p5 }
  0x3b   : > { %p441_p6 = por %p440_p4, %p439_p2 }
  0x3d   : > { %p442_p8 = pnand %p441_p6, %p435_p7 }
  0x3f   : > { %445 = shalt.err (!%p442_p8)
}
  0x40   : > { %s446_s28 = scalar_lea.vmem %s684_s5, 128  ;;  %s550_s27 = smov [#allocation5]  }
  0x41   : > { %p447_p9 = scmp.ne.s32.totalorder %s684_s5, %s446_s28  ;;  %s451_s30 = sshll.u32 %s550_s27, 4  ;;  %s452_s30 = int_to_ptr.vmem [resolvable:$false] %s451_s30 }
  0x42   : > { %s453_s3 = scalar_lea.vmem %s452_s30, 256  ;;  %p454_p5 = scmp.lt.s32.totalorder %s684_s5, %s452_s30 }
  0x43   : > { %p449_p12 = pnand %p447_p9, %p433_p3  ;;  %p455_p10 = scmp.lt.s32.totalorder %s453_s3, %s446_s28 }
  0x45   : > { %p450_p0 = pneg %p449_p12  ;;  %p456_p1 = por %p455_p10, %p454_p5 }
  0x47   : > { %p457_p2 = pnand %p456_p1, %p450_p0 }
  0x49   : > { %460 = shalt.err (!%p457_p2)
}
  0x4a   : > { %345 = dma.hbm_to_vmem [thread:$0]  (!%p686_p11), %s682_s4, 128, %s684_s5, %s138_s26  }
  0x4b   : > { %p801_p7 = scmp.ne.s32.totalorder %s794_s21, 0 }
  0x4c   : > { %p802_p3 = scmp.ne.s32.totalorder (!%p801_p7), %s790_s17, 0 }
  0x4d   : > { %158 = sbr.rel (%p801_p7) target bundleno = 114 (0x72), region = 28 }
  0x54   : > { %514 = dma.done.wait (%p802_p3), [#allocation3], 16  }
  0x55   : > { %516 = vsyncadd (%p802_p3), [#allocation3], 4294967280  ;;  %s722_s18 = sand.u32 1, %s531_s10   ;;  %p803_p4 = scmp.ne.s32.totalorder %s792_s19, 0 }
  0x56   : > { %s323_s7 = sshll.u32 %s722_s18, 3  ;;  %s165_s6 = scalar_lea.sflag [#allocation6], %s722_s18 }
  0x57   : > { %s168_s8 = scalar_lea.vmem [#allocation5], %s323_s7 }
  0x58   : > { %518 = dma.done.wait (%p803_p4), %s165_s6, 128  }
  0x59   : > { %520 = vsyncadd (%p803_p4), %s165_s6, 4294967168  ;;  %v189_v0 = vlaneseq  ;;  %v325_v3 = vld [vmem:[#allocation2] ss:$0 sm:$0xff]  ;;  %v203_v4 = vld [vmem:[%s168_s8] sm:$0xff]  ;;  %s188_s17 = scalar_lea.vmem [#allocation7], %s323_s7  ;;  %s327_s4 = sshll.u32 %s539_s12, 7 }
  0x5a   : > { %s222_s21 = sshll.u32 %s188_s17, 4  ;;  %v204_v6 = vmul.f32 11.313708, %v203_v4  ;;  %s736_s19 = scalar_lea.hbm %s785_s2, %s327_s4  ;;  %s731_s21 = int_to_ptr.vmem [resolvable:$true] %s222_s21 }
  0x5b   : > { %v190_v1 = vshrl.u32 %v189_v0, 7  ;;  %s208_s15 = scalar_lea.sflag [#allocation4], %s722_s18  ;;  %s461_s16 = scalar_lea.vmem %s731_s21, 128 }
  0x5c   : > { %p462_p11 = scmp.ne.s32.totalorder %s731_s21, %s461_s16  ;;  %s551_s12 = smov [#allocation7]  }
  0x5d   : > { %v194_v2 = vcvt.s32.f32 %v190_v1  ;;  %s465_s22 = sshll.u32 %s551_s12, 4  ;;  %s466_s22 = int_to_ptr.vmem [resolvable:$false] %s465_s22 }
  0x5e   : > { %p463_p6 = pnand %p462_p11, %p668_p13  ;;  %s467_s23 = scalar_lea.vmem %s466_s22, 256 }
  0x5f   : > { %v202_v5 = vmul.f32 %v325_v3, %v194_v2  ;;  %p468_p9 = scmp.lt.s32.totalorder %s731_s21, %s466_s22  ;;  %p469_p12 = scmp.lt.s32.totalorder %s467_s23, %s461_s16 }
  0x60   : > { %p464_p8 = pneg %p463_p6 }
  0x61   : > { %v205_v7 = vadd.f32 %v204_v6, %v202_v5  ;;  %p470_p0 = por %p469_p12, %p468_p9 }
  0x63   : > { %206 = vst [vmem:[%s188_s17] sm:$0xff] %v205_v7  ;;  %p471_p5 = pnand %p470_p0, %p464_p8 }
  0x65   : > { %474 = shalt.err (!%p471_p5)
}
  0x66   : > { %s475_s28 = scalar_lea.hbm %s736_s19, 128  ;;  %s479_s3 = scalar_lea.hbm %s785_s2, 256 }
  0x67   : > { %p476_p10 = scmp.ne.s32.totalorder %s736_s19, %s475_s28  ;;  %p480_p7 = scmp.lt.u32.totalorder %s736_s19, %s785_s2 }
  0x68   : > { %p481_p3 = scmp.lt.u32.totalorder %s479_s3, %s475_s28  ;;  %p483_p11 = scmp.lt.u32.totalorder %s475_s28, %s736_s19 }
  0x69   : > { %p477_p1 = pnand %p476_p10, %p668_p13 }
  0x6a   : > { %p482_p4 = por %p481_p3, %p480_p7 }
  0x6b   : > { %p478_p2 = pneg %p477_p1 }
  0x6c   : > { %p484_p6 = por %p483_p11, %p482_p4 }
  0x6e   : > { %p485_p8 = pnand %p484_p6, %p478_p2 }
  0x70   : > { %488 = shalt.err (!%p485_p8)
}
  0x71   : > { %336 = dma.vmem_to_hbm [thread:$0]  (%p668_p13), %s731_s21, 128, %s736_s19, %s208_s15  }
  0x72 PF: > { %s234_s6 = sand.u32 1, %s527_s9   ;;  %p804_p9 = scmp.ne.s32.totalorder %s793_s20, 0 }
  0x73   : > { %p805_p12 = scmp.ge.s32.totalorder %s547_s14, 2  ;;  %s235_s8 = scalar_lea.sflag [#allocation4], %s234_s6 }
  0x75   : > { %p347_p0 = pnand %p805_p12, %p804_p9 }
  0x77   : > { %522 = dma.done.wait (!%p347_p0), %s235_s8, 128  }
  0x78   : > { %524 = vsyncadd (!%p347_p0), %s235_s8, 4294967168  ;;  %s19_s14 = sadd.s32 1, %s547_s14   ;;  %s806_s9 = smov %s531_s10 }
  0x79   : > { %p16_p5 = scmp.ge.s32.totalorder %s19_s14, 4   ;;  %s807_s10 = smov %s535_s11 }
  0x7a   : > { %s808_s11 = smov %s676_s29  ;;  %s809_s12 = smov %s543_s13 }
  0x7b   : > { %s810_s13 = smov %s812_s25  ;;  %18 = sbr.rel (!%p16_p5) target bundleno = 7 (0x7), region = 78 }
  0x82   :  { %240 = vsyncpa [#allocation3], 1 }
  0x83   :  { %242 = vsyncpa [#allocation3 + $0x1], 1 }
  0x84   :  { %243 = vsyncpa [#allocation6], 1 }
  0x85   :  { %245 = vsyncpa [#allocation6 + $0x1], 1 }
  0x86   :  { %246 = vsyncpa [#allocation4], 1 }
  0x87   :  { %248 = vsyncpa [#allocation4 + $0x1], 1 }

</bundles_post_ra>
